<compile_context>
chip_gen: v7x
topology: tpu7x:2x2x1
jax: 0.10.0
libtpu: 0.0.40
codegen_flags: <defaults>
</compile_context>

<pallas_src>
import functools
import math

import jax
import jax.numpy as jnp
from jax import lax
from jax.experimental import pallas as pl
from jax.experimental.pallas import tpu as pltpu


_CONTRACT_LAST = (((1,), (1,)), ((), ()))  # contract last dim of both operands


def _round_up(a: int, b: int) -> int:
    return ((a + b - 1) // b) * b


def _sas_flash_kernel(x_q_ref, x_kv_ref, wq_ref, wk_ref, wv_ref, o_ref,
                      q_scr, m_scr, l_scr, acc_scr, *,
                      scale, n_valid, tkv, masked, compute_dtype):
    ki = pl.program_id(1)
    nk = pl.num_programs(1)

    def maybe_cast(a):
        return a if compute_dtype is None else a.astype(compute_dtype)

    # ---- init (first kv step of each q tile): project + scale Q, zero stats ----
    @pl.when(ki == 0)
    def _init():
        q = lax.dot_general(maybe_cast(x_q_ref[...]), maybe_cast(wq_ref[...]),
                            _CONTRACT_LAST, preferred_element_type=jnp.float32)
        q_scr[...] = q * scale                       # fold 1/sqrt(dout) into Q
        m_scr[...] = jnp.full(m_scr.shape, -jnp.inf, jnp.float32)
        l_scr[...] = jnp.zeros(l_scr.shape, jnp.float32)
        acc_scr[...] = jnp.zeros(acc_scr.shape, jnp.float32)

    # ---- K/V projection for this kv tile (x @ W^T without any transpose) -------
    x_kv = maybe_cast(x_kv_ref[...])
    kv_dtype = jnp.float32 if compute_dtype is None else compute_dtype
    k = lax.dot_general(x_kv, maybe_cast(wk_ref[...]), _CONTRACT_LAST,
                        preferred_element_type=kv_dtype)        # [tkv, dout_p]
    v = lax.dot_general(x_kv, maybe_cast(wv_ref[...]), _CONTRACT_LAST,
                        preferred_element_type=kv_dtype)        # [tkv, dout_p]

    # ---- scores: contract the dout dim of Q and K directly (no K^T) ------------
    q = maybe_cast(q_scr[...])
    s = lax.dot_general(q, k, _CONTRACT_LAST,
                        preferred_element_type=jnp.float32)     # [tq, tkv]

    if masked:  # static decision: mask zero-padded key rows
        col = ki * tkv + lax.broadcasted_iota(jnp.int32, s.shape, 1)
        s = jnp.where(col < n_valid, s, -jnp.inf)

    # ---- online softmax update (element-wise math stays in f32) ----------------
    m_prev = m_scr[...]
    m_new = jnp.maximum(m_prev, jnp.max(s, axis=-1, keepdims=True))
    alpha = jnp.exp(m_prev - m_new)
    p = jnp.exp(s - m_new)                                       # [tq, tkv] f32
    l_scr[...] = alpha * l_scr[...] + jnp.sum(p, axis=-1, keepdims=True)
    acc_scr[...] = alpha * acc_scr[...] + jnp.dot(
        maybe_cast(p), v, preferred_element_type=jnp.float32)    # [tq, dout_p]
    m_scr[...] = m_new

    # ---- finalize: normalize with approx EUP reciprocal and store --------------
    @pl.when(ki == nk - 1)
    def _finalize():
        inv_l = pl.reciprocal(l_scr[...], approx=True)
        o_ref[...] = (acc_scr[...] * inv_l).astype(o_ref.dtype)


def sas_v2(x, wq, wk, wv, *, tq=256, tkv=512, compute_dtype=None):
    """SASv2 forward pass.

    x:          [N, din]
    wq/wk/wv:   [dout, din]   (PyTorch nn.Linear weight layout, no bias)
    returns:    [N, dout]
    """
    n, din = x.shape
    dout = wq.shape[0]
    assert wq.shape == wk.shape == wv.shape == (dout, din)
    scale = 1.0 / (float(dout) ** 0.5)

    # Lane-dense output/projection width: pad dout to a multiple of 128 with zero
    # weight rows (extra Q/K cols contribute 0 to scores, extra V cols give zero
    # output columns that are sliced off below).
    dout_p = _round_up(dout, 128)
    if dout_p != dout:
        pad = ((0, dout_p - dout), (0, 0))
        wq = jnp.pad(wq, pad)
        wk = jnp.pad(wk, pad)
        wv = jnp.pad(wv, pad)

    # Tile sizes: multiples of 8 sublanes, clamped to the sequence length.
    n8 = _round_up(n, 8)
    tq = min(_round_up(tq, 8), n8)
    tkv = min(_round_up(tkv, 8), n8)
    n_p = _round_up(n, math.lcm(tq, tkv))
    if n_p != n:
        x = jnp.pad(x, ((0, n_p - n), (0, 0)))

    grid = (n_p // tq, n_p // tkv)  # (q tiles: parallel, kv tiles: arbitrary)

    kernel = functools.partial(
        _sas_flash_kernel, scale=scale, n_valid=n, tkv=tkv,
        masked=(n_p != n), compute_dtype=compute_dtype)

    out = pl.pallas_call(
        kernel,
        out_shape=jax.ShapeDtypeStruct((n_p, dout_p), x.dtype),
        grid_spec=pltpu.PrefetchScalarGridSpec(
            num_scalar_prefetch=0,
            grid=grid,
            in_specs=[
                pl.BlockSpec((tq, din), lambda qi, ki: (qi, 0)),     # x rows for Q
                pl.BlockSpec((tkv, din), lambda qi, ki: (ki, 0)),    # x rows for K/V
                pl.BlockSpec((dout_p, din), lambda qi, ki: (0, 0)),  # Wq
                pl.BlockSpec((dout_p, din), lambda qi, ki: (0, 0)),  # Wk
                pl.BlockSpec((dout_p, din), lambda qi, ki: (0, 0)),  # Wv
            ],
            out_specs=pl.BlockSpec((tq, dout_p), lambda qi, ki: (qi, 0)),
            scratch_shapes=[
                pltpu.VMEM((tq, dout_p), jnp.float32),   # scaled Q tile
                pltpu.VMEM((tq, 1), jnp.float32),        # running max m
                pltpu.VMEM((tq, 1), jnp.float32),        # running denom l
                pltpu.VMEM((tq, dout_p), jnp.float32),   # output accumulator
            ],
        ),
        compiler_params=pltpu.CompilerParams(
            dimension_semantics=("parallel", "arbitrary"),
            vmem_limit_bytes=48 * 1024 * 1024,
        ),
    )(x, x, wq, wk, wv)

    return out[:n, :dout]


def sas_v2_ref(x, wq, wk, wv):
    dout = wq.shape[0]
    q = x @ wq.T
    k = x @ wk.T
    v = x @ wv.T
    scores = q @ k.T / (dout ** 0.5)
    w = jax.nn.softmax(scores, axis=-1)
    return w @ v


if __name__ == "__main__":
    def make_inputs(key, n, din, dout):
        kx, kq, kk, kv = jax.random.split(key, 4)
        bound = 1.0 / (din ** 0.5)
        x = jax.random.normal(kx, (n, din), dtype=jnp.float32)
        wq = jax.random.uniform(kq, (dout, din), minval=-bound, maxval=bound,
                                dtype=jnp.float32)
        wk = jax.random.uniform(kk, (dout, din), minval=-bound, maxval=bound,
                                dtype=jnp.float32)
        wv = jax.random.uniform(kv, (dout, din), minval=-bound, maxval=bound,
                                dtype=jnp.float32)
        return x, wq, wk, wv

    k1, k2 = jax.random.split(jax.random.PRNGKey(0))

    # Small shape matching the module (single q/kv tile).
    x, wq, wk, wv = make_inputs(k1, n=8, din=32, dout=32)
    out = jax.block_until_ready(sas_v2(x, wq, wk, wv))
    ref = sas_v2_ref(x, wq, wk, wv)
    assert out.shape == ref.shape
    err = float(jnp.max(jnp.abs(out - ref)))
    assert jnp.allclose(out, ref, atol=3e-3, rtol=3e-3), f"f32 mismatch: {err}"

    # Multi-tile path: exercises padding, kv masking and the online softmax.
    x2, wq2, wk2, wv2 = make_inputs(k2, n=200, din=32, dout=32)
    out2 = jax.block_until_ready(sas_v2(x2, wq2, wk2, wv2, tq=64, tkv=128))
    ref2 = sas_v2_ref(x2, wq2, wk2, wv2)
    err2 = float(jnp.max(jnp.abs(out2 - ref2)))
    assert jnp.allclose(out2, ref2, atol=3e-3, rtol=3e-3), f"tiled mismatch: {err2}"

    # bf16 MXU operands (f32 accumulation + f32 softmax math): looser tolerance.
    out3 = jax.block_until_ready(
        sas_v2(x2, wq2, wk2, wv2, tq=64, tkv=128, compute_dtype=jnp.bfloat16))
    err3 = float(jnp.max(jnp.abs(out3 - ref2)))
    assert jnp.allclose(out3, ref2, atol=5e-2, rtol=5e-2), f"bf16 mismatch: {err3}"

    print("KERNEL_OK")
</pallas_src>

<mosaic_0001>
module attributes {stable_mosaic.version = 11 : i64} {
  func.func @_sas_flash_kernel(%arg0: i32, %arg1: i32, %arg2: memref<8x32xf32, #tpu.memory_space<vmem>>, %arg3: memref<8x32xf32, #tpu.memory_space<vmem>>, %arg4: memref<128x32xf32, #tpu.memory_space<vmem>>, %arg5: memref<128x32xf32, #tpu.memory_space<vmem>>, %arg6: memref<128x32xf32, #tpu.memory_space<vmem>>, %arg7: memref<8x128xf32, #tpu.memory_space<vmem>>, %arg8: memref<8x128xf32, #tpu.memory_space<vmem>>, %arg9: memref<8x1xf32, #tpu.memory_space<vmem>>, %arg10: memref<8x1xf32, #tpu.memory_space<vmem>>, %arg11: memref<8x128xf32, #tpu.memory_space<vmem>>) attributes {dimension_semantics = [#tpu.dimension_semantics<parallel>, #tpu.dimension_semantics<arbitrary>], iteration_bounds = array<i64: 1, 1>, scalar_prefetch = 0 : i64, scratch_operands = 4 : i64, tpu.core_type = #tpu.core_type<tc>, window_params = [{transform_indices = @transform_0, window_bounds = array<i64: 8, 32>}, {transform_indices = @transform_1, window_bounds = array<i64: 8, 32>}, {pipeline_mode = #tpu.pipeline_mode<synchronous>, transform_indices = @transform_2, window_bounds = array<i64: 128, 32>}, {pipeline_mode = #tpu.pipeline_mode<synchronous>, transform_indices = @transform_3, window_bounds = array<i64: 128, 32>}, {pipeline_mode = #tpu.pipeline_mode<synchronous>, transform_indices = @transform_4, window_bounds = array<i64: 128, 32>}, {transform_indices = @transform_5, window_bounds = array<i64: 8, 128>}]} {
    %c0_i32 = arith.constant 0 : i32
    %0 = arith.cmpi eq, %arg1, %c0_i32 : i32
    %1 = arith.extui %0 : i1 to i32
    %c0_i32_0 = arith.constant 0 : i32
    %2 = arith.cmpi ne, %1, %c0_i32_0 : i32
    scf.if %2 {
      %c0_27 = arith.constant 0 : index
      %c0_28 = arith.constant 0 : index
      %35 = vector.load %arg2[%c0_27, %c0_28] : memref<8x32xf32, #tpu.memory_space<vmem>>, vector<8x32xf32>
      %c0_29 = arith.constant 0 : index
      %c0_30 = arith.constant 0 : index
      %36 = vector.load %arg4[%c0_29, %c0_30] : memref<128x32xf32, #tpu.memory_space<vmem>>, vector<128x32xf32>
      %cst_31 = arith.constant dense<0.000000e+00> : vector<8x128xf32>
      %37 = tpu.matmul %35, %36, %cst_31 {dimension_numbers = #tpu.dot_dimension_numbers<[1], [1], [0], [0], [0, 0, 1, 0], [], []>} : vector<8x32xf32>, vector<128x32xf32>, vector<8x128xf32> -> vector<8x128xf32>
      %cst_32 = arith.constant 0.176776692 : f32
      %38 = vector.broadcast %cst_32 : f32 to vector<8x128xf32>
      %39 = arith.mulf %37, %38 : vector<8x128xf32>
      %c0_33 = arith.constant 0 : index
      %c0_34 = arith.constant 0 : index
      %40 = vector.load %arg8[%c0_33, %c0_34] : memref<8x128xf32, #tpu.memory_space<vmem>>, vector<8x128xf32>
      tpu.vector_store %arg8[%c0_33, %c0_34], %39 {strides = array<i32>} : memref<8x128xf32, #tpu.memory_space<vmem>>, vector<8x128xf32>,
      %cst_35 = arith.constant 0xFF800000 : f32
      %41 = vector.broadcast %cst_35 : f32 to vector<8x1xf32>
      %c0_36 = arith.constant 0 : index
      %c0_37 = arith.constant 0 : index
      %42 = vector.load %arg9[%c0_36, %c0_37] : memref<8x1xf32, #tpu.memory_space<vmem>>, vector<8x1xf32>
      tpu.vector_store %arg9[%c0_36, %c0_37], %41 {strides = array<i32>} : memref<8x1xf32, #tpu.memory_space<vmem>>, vector<8x1xf32>,
      %cst_38 = arith.constant 0.000000e+00 : f32
      %43 = vector.broadcast %cst_38 : f32 to vector<8x1xf32>
      %c0_39 = arith.constant 0 : index
      %c0_40 = arith.constant 0 : index
      %44 = vector.load %arg10[%c0_39, %c0_40] : memref<8x1xf32, #tpu.memory_space<vmem>>, vector<8x1xf32>
      tpu.vector_store %arg10[%c0_39, %c0_40], %43 {strides = array<i32>} : memref<8x1xf32, #tpu.memory_space<vmem>>, vector<8x1xf32>,
      %cst_41 = arith.constant 0.000000e+00 : f32
      %45 = vector.broadcast %cst_41 : f32 to vector<8x128xf32>
      %c0_42 = arith.constant 0 : index
      %c0_43 = arith.constant 0 : index
      %46 = vector.load %arg11[%c0_42, %c0_43] : memref<8x128xf32, #tpu.memory_space<vmem>>, vector<8x128xf32>
      tpu.vector_store %arg11[%c0_42, %c0_43], %45 {strides = array<i32>} : memref<8x128xf32, #tpu.memory_space<vmem>>, vector<8x128xf32>,
    } else {
    }
    %c0 = arith.constant 0 : index
    %c0_1 = arith.constant 0 : index
    %3 = vector.load %arg3[%c0, %c0_1] : memref<8x32xf32, #tpu.memory_space<vmem>>, vector<8x32xf32>
    %c0_2 = arith.constant 0 : index
    %c0_3 = arith.constant 0 : index
    %4 = vector.load %arg5[%c0_2, %c0_3] : memref<128x32xf32, #tpu.memory_space<vmem>>, vector<128x32xf32>
    %cst = arith.constant dense<0.000000e+00> : vector<8x128xf32>
    %5 = tpu.matmul %3, %4, %cst {dimension_numbers = #tpu.dot_dimension_numbers<[1], [1], [0], [0], [0, 0, 1, 0], [], []>} : vector<8x32xf32>, vector<128x32xf32>, vector<8x128xf32> -> vector<8x128xf32>
    %c0_4 = arith.constant 0 : index
    %c0_5 = arith.constant 0 : index
    %6 = vector.load %arg6[%c0_4, %c0_5] : memref<128x32xf32, #tpu.memory_space<vmem>>, vector<128x32xf32>
    %cst_6 = arith.constant dense<0.000000e+00> : vector<8x128xf32>
    %7 = tpu.matmul %3, %6, %cst_6 {dimension_numbers = #tpu.dot_dimension_numbers<[1], [1], [0], [0], [0, 0, 1, 0], [], []>} : vector<8x32xf32>, vector<128x32xf32>, vector<8x128xf32> -> vector<8x128xf32>
    %c0_7 = arith.constant 0 : index
    %c0_8 = arith.constant 0 : index
    %8 = vector.load %arg8[%c0_7, %c0_8] : memref<8x128xf32, #tpu.memory_space<vmem>>, vector<8x128xf32>
    %cst_9 = arith.constant dense<0.000000e+00> : vector<8x8xf32>
    %9 = tpu.matmul %8, %5, %cst_9 {dimension_numbers = #tpu.dot_dimension_numbers<[1], [1], [0], [0], [0, 0, 1, 0], [], []>} : vector<8x128xf32>, vector<8x128xf32>, vector<8x8xf32> -> vector<8x8xf32>
    %c0_10 = arith.constant 0 : index
    %c0_11 = arith.constant 0 : index
    %10 = vector.load %arg9[%c0_10, %c0_11] : memref<8x1xf32, #tpu.memory_space<vmem>>, vector<8x1xf32>
    %cst_12 = arith.constant dense<0xFF800000> : vector<8xf32>
    %11 = vector.multi_reduction <maximumf>, %9, %cst_12 [1] : vector<8x8xf32> to vector<8xf32>
    %12 = vector.shape_cast %11 : vector<8xf32> to vector<8x1xf32>
    %13 = arith.maximumf %10, %12 : vector<8x1xf32>
    %14 = arith.subf %10, %13 : vector<8x1xf32>
    %15 = math.exp %14 : vector<8x1xf32>
    %16 = vector.broadcast %13 : vector<8x1xf32> to vector<8x8xf32>
    %17 = arith.subf %9, %16 : vector<8x8xf32>
    %18 = math.exp %17 : vector<8x8xf32>
    %c0_13 = arith.constant 0 : index
    %c0_14 = arith.constant 0 : index
    %19 = vector.load %arg10[%c0_13, %c0_14] : memref<8x1xf32, #tpu.memory_space<vmem>>, vector<8x1xf32>
    %20 = arith.mulf %15, %19 : vector<8x1xf32>
    %cst_15 = arith.constant dense<0.000000e+00> : vector<8xf32>
    %21 = vector.multi_reduction <add>, %18, %cst_15 [1] : vector<8x8xf32> to vector<8xf32>
    %22 = vector.shape_cast %21 : vector<8xf32> to vector<8x1xf32>
    %23 = arith.addf %20, %22 : vector<8x1xf32>
    %c0_16 = arith.constant 0 : index
    %c0_17 = arith.constant 0 : index
    %24 = vector.load %arg10[%c0_16, %c0_17] : memref<8x1xf32, #tpu.memory_space<vmem>>, vector<8x1xf32>
    tpu.vector_store %arg10[%c0_16, %c0_17], %23 {strides = array<i32>} : memref<8x1xf32, #tpu.memory_space<vmem>>, vector<8x1xf32>,
    %c0_18 = arith.constant 0 : index
    %c0_19 = arith.constant 0 : index
    %25 = vector.load %arg11[%c0_18, %c0_19] : memref<8x128xf32, #tpu.memory_space<vmem>>, vector<8x128xf32>
    %26 = vector.broadcast %15 : vector<8x1xf32> to vector<8x128xf32>
    %27 = arith.mulf %26, %25 : vector<8x128xf32>
    %cst_20 = arith.constant dense<0.000000e+00> : vector<8x128xf32>
    %28 = tpu.matmul %18, %7, %cst_20 {dimension_numbers = #tpu.dot_dimension_numbers<[1], [0], [0], [1], [0, 0, 1, 1], [], []>} : vector<8x8xf32>, vector<8x128xf32>, vector<8x128xf32> -> vector<8x128xf32>
    %29 = arith.addf %27, %28 : vector<8x128xf32>
    %c0_21 = arith.constant 0 : index
    %c0_22 = arith.constant 0 : index
    %30 = vector.load %arg11[%c0_21, %c0_22] : memref<8x128xf32, #tpu.memory_space<vmem>>, vector<8x128xf32>
    tpu.vector_store %arg11[%c0_21, %c0_22], %29 {strides = array<i32>} : memref<8x128xf32, #tpu.memory_space<vmem>>, vector<8x128xf32>,
    %c0_23 = arith.constant 0 : index
    %c0_24 = arith.constant 0 : index
    %31 = vector.load %arg9[%c0_23, %c0_24] : memref<8x1xf32, #tpu.memory_space<vmem>>, vector<8x1xf32>
    tpu.vector_store %arg9[%c0_23, %c0_24], %13 {strides = array<i32>} : memref<8x1xf32, #tpu.memory_space<vmem>>, vector<8x1xf32>,
    %c0_i32_25 = arith.constant 0 : i32
    %32 = arith.cmpi eq, %arg1, %c0_i32_25 : i32
    %33 = arith.extui %32 : i1 to i32
    %c0_i32_26 = arith.constant 0 : i32
    %34 = arith.cmpi ne, %33, %c0_i32_26 : i32
    scf.if %34 {
      %c0_27 = arith.constant 0 : index
      %c0_28 = arith.constant 0 : index
      %35 = vector.load %arg10[%c0_27, %c0_28] : memref<8x1xf32, #tpu.memory_space<vmem>>, vector<8x1xf32>
      %36 = tpu.reciprocal %35 {approx = true} : vector<8x1xf32> -> vector<8x1xf32>
      %c0_29 = arith.constant 0 : index
      %c0_30 = arith.constant 0 : index
      %37 = vector.load %arg11[%c0_29, %c0_30] : memref<8x128xf32, #tpu.memory_space<vmem>>, vector<8x128xf32>
      %38 = vector.broadcast %36 : vector<8x1xf32> to vector<8x128xf32>
      %39 = arith.mulf %37, %38 : vector<8x128xf32>
      %c0_31 = arith.constant 0 : index
      %c0_32 = arith.constant 0 : index
      %40 = vector.load %arg7[%c0_31, %c0_32] : memref<8x128xf32, #tpu.memory_space<vmem>>, vector<8x128xf32>
      tpu.vector_store %arg7[%c0_31, %c0_32], %39 {strides = array<i32>} : memref<8x128xf32, #tpu.memory_space<vmem>>, vector<8x128xf32>,
    } else {
    }
    return
  }
  func.func @transform_0(%arg0: i32, %arg1: i32) -> (i32, i32) {
    %c0_i32 = arith.constant 0 : i32
    %c0_i32_0 = arith.constant 0 : i32
    return %arg0, %c0_i32 : i32, i32
  }
  func.func @transform_1(%arg0: i32, %arg1: i32) -> (i32, i32) {
    %c0_i32 = arith.constant 0 : i32
    %c0_i32_0 = arith.constant 0 : i32
    return %arg1, %c0_i32 : i32, i32
  }
  func.func @transform_2(%arg0: i32, %arg1: i32) -> (i32, i32) {
    %c0_i32 = arith.constant 0 : i32
    %c0_i32_0 = arith.constant 0 : i32
    %c0_i32_1 = arith.constant 0 : i32
    return %c0_i32, %c0_i32_0 : i32, i32
  }
  func.func @transform_3(%arg0: i32, %arg1: i32) -> (i32, i32) {
    %c0_i32 = arith.constant 0 : i32
    %c0_i32_0 = arith.constant 0 : i32
    %c0_i32_1 = arith.constant 0 : i32
    return %c0_i32, %c0_i32_0 : i32, i32
  }
  func.func @transform_4(%arg0: i32, %arg1: i32) -> (i32, i32) {
    %c0_i32 = arith.constant 0 : i32
    %c0_i32_0 = arith.constant 0 : i32
    %c0_i32_1 = arith.constant 0 : i32
    return %c0_i32, %c0_i32_0 : i32, i32
  }
  func.func @transform_5(%arg0: i32, %arg1: i32) -> (i32, i32) {
    %c0_i32 = arith.constant 0 : i32
    %c0_i32_0 = arith.constant 0 : i32
    return %arg0, %c0_i32 : i32, i32
  }
}

</mosaic_0001>

<bundles_post_ra>
// kernel: tpu_custom_call.1
= control target key start
LH: loop header
LB: loop body
LE: loop exit
PB: predicated region body
PF: predicated region fallthrough
CT: control target
= control target key end

     0   :  { %vm42_vm0 = vcmask 261120   ;;  %v1005_v3 = vmov 0.0|0.0   ;;  %vm1006_vm2 = vmmov 0   ;;  %v1007_v8 = vmov 0.0   ;;  %s1304_s0 = inlined_call_operand.vmem [shape: f32[8,32], index: 0, kind: input, shape index: {}]   ;;  %s1305_s1 = inlined_call_operand.vmem [shape: f32[8,32], index: 1, kind: input, shape index: {}]   ;;  %s1306_s2 = inlined_call_operand.vmem [shape: f32[128,32], index: 2, kind: input, shape index: {}]   ;;  %s1307_s3 = inlined_call_operand.vmem [shape: f32[128,32], index: 3, kind: input, shape index: {}]   ;;  %s1308_s4 = inlined_call_operand.vmem [shape: f32[128,32], index: 4, kind: input, shape index: {}]   ;;  %s1309_s5 = inlined_call_operand.hbm [shape: f32[8,128], index: 5, kind: output, shape index: {}]  }
   0x1   :  { %v171_v0 = vld [vmem:[%s1307_s3] sm:$0xff]  ;;  %v172_v1 = vld [vmem:[%s1307_s3 + $0x8] sm:$0xff]  ;;  %903 = vmatprep.subr.bf16.mxu1 %v1005_v3  ;;  %871 = vmatprep.subr.bf16.mxu0 %v1005_v3  ;;  %vm1054_vm1 = vmpackc.low %vm42_vm0, %vm42_vm0 }
   0x2   :  { %v26_v2 = vld [vmem:[%s1306_s2] sm:$0xff]  ;;  %v904_v5 = vpack.c.bf16 %v172_v1, %v171_v0  ;;  %v27_v6 = vld [vmem:[%s1306_s2 + $0x8] sm:$0xff]  ;;  %823 = vmatprep.mubr.msk.f32.mxu1 %vm1006_vm2, %v1007_v8  ;;  %788 = vmatprep.mubr.msk.f32.mxu0 %vm1006_vm2, %v1007_v8  ;;  %v173_v9 = vld [vmem:[%s1307_s3 + $0x10] sm:$0xff] }
   0x3   :  { %v872_v7 = vpack.c.bf16 %v27_v6, %v26_v2  ;;  %v174_v10 = vld [vmem:[%s1307_s3 + $0x18] sm:$0xff]  ;;  %v28_v11 = vld [vmem:[%s1306_s2 + $0x10] sm:$0xff] }
   0x4   :  { %906 = vmatpush3.bf16.xpose.msk.msra.mxu1 %vm1054_vm1, %v904_v5  ;;  %v29_v12 = vld [vmem:[%s1306_s2 + $0x18] sm:$0xff]  ;;  %v908_v13 = vpack.c.bf16 %v174_v10, %v173_v9 }
   0x5   :  { %874 = vmatpush3.bf16.xpose.msk.msra.mxu0 %vm1054_vm1, %v872_v7  ;;  %907 = vmatprep.subr.bf16.mxu1 %v1005_v3  ;;  %v876_v14 = vpack.c.bf16 %v29_v12, %v28_v11 }
   0x6   :  { %875 = vmatprep.subr.bf16.mxu0 %v1005_v3 }
   0xc   :  { %910 = vmatpush3.bf16.xpose.msk.msra.mxu1 %vm1054_vm1, %v908_v13 }
   0xd   :  { %10 = vsyncpa [#allocation7], 0  ;;  %878 = vmatpush3.bf16.xpose.msk.msra.mxu0 %vm1054_vm1, %v876_v14  ;;  %911 = vmatprep.subr.bf16.mxu1 %v1005_v3  ;;  %v175_v15 = vld [vmem:[%s1307_s3 + $0x20] sm:$0xff]  ;;  %v176_v16 = vld [vmem:[%s1307_s3 + $0x28] sm:$0xff]  ;;  %vm166_vm3 = vcmask 7168   ;;  %v1008_v61 = vmov -inf  }
   0xe   :  { %879 = vmatprep.subr.bf16.mxu0 %v1005_v3  ;;  %v30_v17 = vld [vmem:[%s1306_s2 + $0x20] sm:$0xff]  ;;  %v31_v18 = vld [vmem:[%s1306_s2 + $0x28] sm:$0xff]  ;;  %v912_v19 = vpack.c.bf16 %v176_v16, %v175_v15  ;;  %v177_v21 = vld [vmem:[%s1307_s3 + $0x30] sm:$0xff]  ;;  %167 = vst.msk [vmem:[#allocation3] sm:$0xff] %vm166_vm3, %v1008_v61  ;;  %vm515_vm4 = vcmask 64512  }
   0xf   :  { %v880_v20 = vpack.c.bf16 %v31_v18, %v30_v17  ;;  %v178_v22 = vld [vmem:[%s1307_s3 + $0x38] sm:$0xff]  ;;  %v32_v23 = vld [vmem:[%s1306_s2 + $0x30] sm:$0xff]  ;;  %v179_v27 = vld [vmem:[%s1307_s3 + $0x40] sm:$0xff]  ;;  %168 = vst.msk [vmem:[#allocation4] sm:$0xff] %vm166_vm3, %v1007_v8 }
  0x10   :  { %v33_v24 = vld [vmem:[%s1306_s2 + $0x38] sm:$0xff]  ;;  %v916_v25 = vpack.c.bf16 %v178_v22, %v177_v21  ;;  %v180_v28 = vld [vmem:[%s1307_s3 + $0x48] sm:$0xff]  ;;  %v34_v29 = vld [vmem:[%s1306_s2 + $0x40] sm:$0xff] }
  0x11   :  { %v884_v26 = vpack.c.bf16 %v33_v24, %v32_v23  ;;  %v35_v30 = vld [vmem:[%s1306_s2 + $0x48] sm:$0xff]  ;;  %v920_v31 = vpack.c.bf16 %v180_v28, %v179_v27  ;;  %v181_v33 = vld [vmem:[%s1307_s3 + $0x50] sm:$0xff]  ;;  %v182_v34 = vld [vmem:[%s1307_s3 + $0x58] sm:$0xff] }
  0x12   :  { %v888_v32 = vpack.c.bf16 %v35_v30, %v34_v29  ;;  %v36_v35 = vld [vmem:[%s1306_s2 + $0x50] sm:$0xff]  ;;  %v37_v36 = vld [vmem:[%s1306_s2 + $0x58] sm:$0xff]  ;;  %v924_v37 = vpack.c.bf16 %v182_v34, %v181_v33  ;;  %v183_v39 = vld [vmem:[%s1307_s3 + $0x60] sm:$0xff] }
  0x13   :  { %v892_v38 = vpack.c.bf16 %v37_v36, %v36_v35  ;;  %v184_v40 = vld [vmem:[%s1307_s3 + $0x68] sm:$0xff]  ;;  %v38_v41 = vld [vmem:[%s1306_s2 + $0x60] sm:$0xff]  ;;  %v185_v45 = vld [vmem:[%s1307_s3 + $0x70] sm:$0xff] }
  0x14   :  { %914 = vmatpush3.bf16.xpose.msk.msra.mxu1 %vm1054_vm1, %v912_v19  ;;  %v39_v42 = vld [vmem:[%s1306_s2 + $0x68] sm:$0xff]  ;;  %v928_v43 = vpack.c.bf16 %v184_v40, %v183_v39  ;;  %v186_v46 = vld [vmem:[%s1307_s3 + $0x78] sm:$0xff]  ;;  %v40_v47 = vld [vmem:[%s1306_s2 + $0x70] sm:$0xff] }
  0x15   :  { %882 = vmatpush3.bf16.xpose.msk.msra.mxu0 %vm1054_vm1, %v880_v20  ;;  %915 = vmatprep.subr.bf16.mxu1 %v1005_v3  ;;  %v896_v44 = vpack.c.bf16 %v39_v42, %v38_v41  ;;  %v41_v48 = vld [vmem:[%s1306_s2 + $0x78] sm:$0xff]  ;;  %v932_v49 = vpack.c.bf16 %v186_v46, %v185_v45  ;;  %v170_v51 = vld [vmem:[%s1305_s1] sm:$0xff]  ;;  %v310_v59 = vld [vmem:[%s1308_s4 + $0x8] sm:$0xff] }
  0x16   :  { %883 = vmatprep.subr.bf16.mxu0 %v1005_v3  ;;  %v900_v50 = vpack.c.bf16 %v41_v48, %v40_v47  ;;  %v25_v52 = vld [vmem:[%s1304_s0] sm:$0xff]  ;;  %v311_v62 = vld [vmem:[%s1308_s4 + $0x10] sm:$0xff]  ;;  %v312_v63 = vld [vmem:[%s1308_s4 + $0x18] sm:$0xff] }
  0x17   :  { %v309_v58 = vld [vmem:[%s1308_s4] sm:$0xff]  ;;  %v940_v0 = vpack.c.bf16 %v312_v63, %v311_v62  ;;  %v314_v2 = vld [vmem:[%s1308_s4 + $0x28] sm:$0xff]  ;;  %v315_v6 = vld [vmem:[%s1308_s4 + $0x30] sm:$0xff] }
  0x18   :  { %v936_v60 = vpack.c.bf16 %v310_v59, %v309_v58  ;;  %v313_v1 = vld [vmem:[%s1308_s4 + $0x20] sm:$0xff]  ;;  %v316_v7 = vld [vmem:[%s1308_s4 + $0x38] sm:$0xff]  ;;  %v318_v10 = vld [vmem:[%s1308_s4 + $0x48] sm:$0xff] }
  0x19   :  { %v944_v5 = vpack.c.bf16 %v314_v2, %v313_v1  ;;  %v317_v9 = vld [vmem:[%s1308_s4 + $0x40] sm:$0xff]  ;;  %v319_v12 = vld [vmem:[%s1308_s4 + $0x50] sm:$0xff]  ;;  %v320_v13 = vld [vmem:[%s1308_s4 + $0x58] sm:$0xff] }
  0x1a   :  { %v952_v11 = vpack.c.bf16 %v318_v10, %v317_v9  ;;  %v956_v14 = vpack.c.bf16 %v320_v13, %v319_v12  ;;  %v321_v15 = vld [vmem:[%s1308_s4 + $0x60] sm:$0xff]  ;;  %v322_v16 = vld [vmem:[%s1308_s4 + $0x68] sm:$0xff]  ;;  %v323_v18 = vld [vmem:[%s1308_s4 + $0x70] sm:$0xff] }
  0x1b   :  { %v960_v17 = vpack.c.bf16 %v322_v16, %v321_v15  ;;  %v324_v19 = vld [vmem:[%s1308_s4 + $0x78] sm:$0xff]  ;;  %v514_v24 = vld [vmem:[#allocation3] sm:$0xff]  ;;  %v531_v36 = vld [vmem:[#allocation4] sm:$0xff]  ;;  %s1010_s4 = smov [#allocation6]  }
  0x1c   :  { %918 = vmatpush3.bf16.xpose.msk.msra.mxu1 %vm1054_vm1, %v916_v25  ;;  %v964_v20 = vpack.c.bf16 %v324_v19, %v323_v18  ;;  %s641_s10 = sshll.u32 %s1010_s4, 4  ;;  %s642_s10 = int_to_ptr.vmem [resolvable:$true] %s641_s10 }
  0x1d   :  { %886 = vmatpush3.bf16.xpose.msk.msra.mxu0 %vm1054_vm1, %v884_v26  ;;  %919 = vmatprep.subr.bf16.mxu1 %v1005_v3  ;;  %s981_s11 = scalar_lea.vmem %s642_s10, 128  ;;  %p986_p1 = scmp.lt.s32.totalorder %s642_s10, %s642_s10 }
  0x1e   :  { %887 = vmatprep.subr.bf16.mxu0 %v1005_v3  ;;  %p982_p0 = scmp.ne.s32.totalorder %s642_s10, %s981_s11  ;;  %p987_p2 = scmp.lt.s32.totalorder %s981_s11, %s981_s11 }
  0x20   :  { %p988_p3 = por %p987_p2, %p986_p1 }
  0x22   :  { %p989_p4 = pnand %p988_p3, %p982_p0 }
  0x24   :  { %922 = vmatpush3.bf16.xpose.msk.msra.mxu1 %vm1054_vm1, %v920_v31 }
  0x25   :  { %890 = vmatpush3.bf16.xpose.msk.msra.mxu0 %vm1054_vm1, %v888_v32  ;;  %923 = vmatprep.subr.bf16.mxu1 %v1005_v3 }
  0x26   :  { %891 = vmatprep.subr.bf16.mxu0 %v1005_v3 }
  0x2c   :  { %926 = vmatpush3.bf16.xpose.msk.msra.mxu1 %vm1054_vm1, %v924_v37 }
  0x2d   :  { %894 = vmatpush3.bf16.xpose.msk.msra.mxu0 %vm1054_vm1, %v892_v38  ;;  %927 = vmatprep.subr.bf16.mxu1 %v1005_v3 }
  0x2e   :  { %895 = vmatprep.subr.bf16.mxu0 %v1005_v3 }
  0x34   :  { %930 = vmatpush3.bf16.xpose.msk.msra.mxu1 %vm1054_vm1, %v928_v43 }
  0x35   :  { %898 = vmatpush3.bf16.xpose.msk.msra.mxu0 %vm1054_vm1, %v896_v44  ;;  %931 = vmatprep.subr.bf16.mxu1 %v1005_v3 }
  0x36   :  { %899 = vmatprep.subr.bf16.mxu0 %v1005_v3 }
  0x3c   :  { %934 = vmatpush3.bf16.xpose.msk.msra.mxu1 %vm1054_vm1, %v932_v49 }
  0x3d   :  { %902 = vmatpush3.bf16.xpose.msk.msra.mxu0 %vm1054_vm1, %v900_v50  ;;  %861 = vmatprep.subr.mxu1 %v1007_v8 }
  0x3e   :  { %935 = vmatprep.subr.bf16.mxu0 %v1005_v3 }
  0x43   :  { %824 = vmatmul.mubr.msk.f32.vlgmr.msra.gmra.mrb[0].mxu1 %vm42_vm0, %v170_v51 }
  0x44   :  { %789 = vmatmul.mubr.msk.f32.vlgmr.msra.gmra.mrb[0].mxu0 %vm42_vm0, %v25_v52  ;;  %863 = vmatprep.mubr.msk.f32.mxu1 %vm1006_vm2, %v1007_v8 }
  0x45   :  { %858 = vmatprep.mubr.msk.f32.mxu0 %vm1006_vm2, %v1007_v8  ;;  %938 = vmatpush3.bf16.xpose.msk.msra.mxu0 %vm1054_vm1, %v936_v60 }
  0x46   :  { %939 = vmatprep.subr.bf16.mxu0 %v1005_v3 }
  0x4d   :  { %942 = vmatpush3.bf16.xpose.msk.msra.mxu0 %vm1054_vm1, %v940_v0 }
  0x4e   :  { %943 = vmatprep.subr.bf16.mxu0 %v1005_v3 }
  0x55   :  { %946 = vmatpush3.bf16.xpose.msk.msra.mxu0 %vm1054_vm1, %v944_v5 }
  0x56   :  { %947 = vmatprep.subr.bf16.mxu0 %v1005_v3 }
 0x116   :  { %v305_v53 = vpop.f32.mrb[0].mxu1 }
 0x117   :  { %v160_v54 = vpop.f32.mrb[0].mxu0  ;;  %v825_v55 = vpop.f32.mrb[1].mxu1  ;;  %862 = vmatpush3.xpose.msra.mxu1 %v305_v53 }
 0x118   :  { %v164_v56 = vmul.f32 0.17677669, %v160_v54  ;;  %v790_v57 = vpop.f32.mrb[1].mxu0  ;;  %866 = vmatprep.subr.mxu1 %v1007_v8 }
 0x11a   :  { %864 = vmatmul.mubr.f32.vlgmr.msra.gmra.mrb[2].mxu1 %v164_v56 }
 0x11b   :  { %868 = vmatprep.mubr.msk.f32.mxu1 %vm1006_vm2, %v1007_v8  ;;  %v948_v8 = vpack.c.bf16 %v316_v7, %v315_v6 }
 0x11d   :  { %950 = vmatpush3.bf16.xpose.msk.msra.mxu0 %vm1054_vm1, %v948_v8 }
 0x11e   :  { %951 = vmatprep.subr.bf16.mxu0 %v1005_v3 }
 0x125   :  { %954 = vmatpush3.bf16.xpose.msk.msra.mxu0 %vm1054_vm1, %v952_v11 }
 0x126   :  { %955 = vmatprep.subr.bf16.mxu0 %v1005_v3 }
 0x12d   :  { %958 = vmatpush3.bf16.xpose.msk.msra.mxu0 %vm1054_vm1, %v956_v14 }
 0x12e   :  { %959 = vmatprep.subr.bf16.mxu0 %v1005_v3 }
 0x135   :  { %962 = vmatpush3.bf16.xpose.msk.msra.mxu0 %vm1054_vm1, %v960_v17 }
 0x136   :  { %963 = vmatprep.subr.bf16.mxu0 %v1005_v3  ;;  %v1009_v3 = vmov 0  }
 0x137   :  { %973 = vset.pattern.permute.xlu0 %v1009_v3  ;;  %974 = vset.pattern.permute.xlu1 %v1009_v3 }
 0x13d   :  { %966 = vmatpush3.bf16.xpose.msk.msra.mxu0 %vm1054_vm1, %v964_v20 }
 0x144   :  { %859 = vmatmul.mubr.msk.f32.vlgmr.msra.gmra.mrb[2].mxu0 %vm42_vm0, %v170_v51 }
 0x1ed   :  { %v510_v21 = vpop.f32.mrb[2].mxu1 }
 0x1ee   :  { %v865_v22 = vpop.f32.mrb[3].mxu1  ;;  %v516_v23 = vsel %vm515_vm4, %v510_v21, -inf }
 0x1ef   :  { %517 = vmax.xlane.f32.xlu0 %v516_v23 }
 0x217   :  { %v439_v4 = vpop.f32.mrb[2].mxu0 }
 0x218   :  { %867 = vmatpush3.msra.mxu1 %v439_v4  ;;  %v860_v28 = vpop.f32.mrb[3].mxu0 }
 0x27c   :  { %v518_v25 = vpop.xlane.xlu0 %517 }
 0x27d   :  { %v519_v26 = vmax.f32 %v514_v24, %v518_v25 }
 0x27f   :  { %v520_v27 = vsub.f32 %v514_v24, %v519_v26  ;;  %621 = vst.msk [vmem:[#allocation3] sm:$0xff] %vm166_vm3, %v519_v26  ;;  %525 = vperm.xlu0 %973, %v519_v26  }
 0x281   :  { %v521_v34 = vmul.f32 1.442695, %v520_v27 }
 0x2fe   :  { %v526_v29 = vpop.permute.xlu0 %525 }
 0x2ff   :  { %v528_v30 = vsub.f32 %v510_v21, %v526_v29 }
 0x301   :  { %v529_v31 = vmul.f32 1.442695, %v528_v30 }
 0x303   :  { %975 = vpow2.f32 %v529_v31 }
 0x304   :  { %977 = vpow2.f32 %v521_v34 }
 0x30d   :  { %v976_v32 = vpop.eup %975 }
 0x30e   :  { %869 = vmatmul.mubr.msk.f32.vlgmr.msra.gmra.mrb[4].mxu1 %vm515_vm4, %v976_v32  ;;  %v533_v33 = vsel %vm515_vm4, %v976_v32, 0.0  ;;  %v978_v35 = vpop.eup %977 }
 0x30f   :  { %534 = vadd.xlane.f32.xlu1 %v533_v33  ;;  %v532_v37 = vmul.f32 %v978_v35, %v531_v36 }
 0x320   :  { %542 = vperm.xlu1 %974, %v978_v35  }
 0x39c   :  { %v535_v38 = vpop.xlane.xlu1 %534 }
 0x39d   :  { %v536_v39 = vadd.f32 %v535_v38, %v532_v37 }
 0x39f   :  { %538 = vst.msk [vmem:[#allocation4] sm:$0xff] %vm166_vm3, %v536_v39 }
 0x3a0   :  { %v543_v44 = vpop.permute.xlu1 %542 }
 0x3a1   :  { %v545_v45 = vmul.f32 0.0, %v543_v44 }
 0x3a6   :  { %v625_v40 = vld [vmem:[#allocation4] sm:$0xff] }
 0x3a7   :  { %979 = vrcp.f32 %v625_v40 }
 0x3b1   :  { %v980_v41 = vpop.eup %979 }
 0x3b2   :  { %630 = vperm.xlu1 %974, %v980_v41  }
 0x3e1   :  { %v615_v42 = vpop.f32.mrb[4].mxu1 }
 0x3e2   :  { %v870_v43 = vpop.f32.mrb[5].mxu1  ;;  %v619_v46 = vadd.f32 %v615_v42, %v545_v45 }
 0x431   :  { %v631_v47 = vpop.permute.xlu1 %630 }
 0x432   :  { %v633_v48 = vmul.f32 %v631_v47, %v619_v46 }
 0x434   :  { %634 = vst [vmem:[#allocation6] sm:$0xff] %v633_v48 }
 0x435   :  { %992 = shalt.err (!%p989_p4)
}
 0x436   :  { %s993_s14 = scalar_lea.hbm %s1309_s5, 128 }
 0x437   :  { %p994_p5 = scmp.ne.s32.totalorder %s1309_s5, %s993_s14  ;;  %p997_p6 = scmp.lt.u32.totalorder %s993_s14, %s1309_s5 }
 0x439   :  { %p999_p7 = pnand %p997_p6, %p994_p5 }
 0x43b   :  { %1002 = shalt.err (!%p999_p7)
}
 0x43c   :  { %644 = dma.vmem_to_hbm [thread:$0]  %s642_s10, 128, %s1309_s5, [#allocation7]  }
 0x43d   :  { %1003 = dma.done.wait [#allocation7], 128  }
 0x43e   :  { %1004 = vsyncadd [#allocation7], 4294967168 }
 0x43f   :  { %648 = vsyncpa [#allocation7], 1 }

</bundles_post_ra>
